<compile_context>
chip_gen: v7x
topology: tpu7x:2x2x1
jax: 0.10.0
libtpu: 0.0.40
codegen_flags: <defaults>
</compile_context>

<pallas_src>
import functools

import jax
import jax.numpy as jnp
from jax import lax
from jax.experimental import pallas as pl
from jax.experimental.pallas import tpu as pltpu


def _round_up(a, b):
    return (a + b - 1) // b * b


def _vmem_budget_bytes():
    """Generation-aware VMEM request cap (<=75% of physical, <=100 MiB)."""
    cap = 64 * 1024 * 1024                      # conservative (v7x per-TC)
    try:
        info = pltpu.get_tpu_info()
        cap = int(getattr(info, "vmem_capacity_bytes", cap))
    except Exception:
        pass
    return min(int(cap * 3 // 4), 100 * 1024 * 1024)


def _conv_embed_kernel(p_ref, w_ref, prm_ref, o_ref, *, use_norm, eps, inv_cout):
    """Grid = (M tiles,) [parallel].  Whole K resident; fused bias/LN epilogue."""
    # bf16 x bf16 -> f32 on the MXU, full-K reduction in one dot.
    acc = jnp.dot(p_ref[...], w_ref[...], preferred_element_type=jnp.float32)
    acc = acc + prm_ref[0:1, :]                     # conv bias (f32)
    if use_norm:
        gamma = prm_ref[1:2, :]
        beta = prm_ref[2:3, :]
        mask = prm_ref[3:4, :]                      # 1.0 on real channels
        # Padded channel lanes of `acc` are exactly zero (zero weight columns
        # and zero bias), so plain row-sums divided by the *real* channel
        # count are exact.
        mean = jnp.sum(acc, axis=-1, keepdims=True) * inv_cout
        ctr = acc - mean
        ctr_m = ctr * mask
        var = jnp.sum(ctr_m * ctr_m, axis=-1, keepdims=True) * inv_cout
        inv = lax.rsqrt(var + eps)
        acc = ctr * (inv * gamma) + beta            # padded lanes -> 0
    o_ref[...] = acc.astype(o_ref.dtype)


def _im2col_3d_cl(x, k, stride, padding, compute_dtype, k_pad):
    """Channels-last im2col.  x: (B, Cin, H, W, D) -> (B*OH*OW*OD, K + k_pad).

    Columns are kernel-offset-major / Cin-minor, built with a single
    concatenate along the (already minor) channel axis, so there is no
    minor-dim transpose for XLA to materialize between the strided slices and
    the (M, K) matrix.  Lane padding of K (k_pad zero columns) rides along in
    the same concatenate for free.
    """
    B, C, H, W, D = x.shape
    xcl = jnp.transpose(x, (0, 2, 3, 4, 1)).astype(compute_dtype)  # small vs patches
    xp = jnp.pad(xcl, ((0, 0), (padding, padding), (padding, padding),
                       (padding, padding), (0, 0)))
    OH = (H + 2 * padding - k) // stride + 1
    OW = (W + 2 * padding - k) // stride + 1
    OD = (D + 2 * padding - k) // stride + 1
    cols = []
    for i in range(k):
        for j in range(k):
            for l in range(k):
                cols.append(xp[:, i:i + stride * OH:stride,
                               j:j + stride * OW:stride,
                               l:l + stride * OD:stride, :])   # (B,OH,OW,OD,Cin)
    if k_pad:
        cols.append(jnp.zeros((B, OH, OW, OD, k_pad), compute_dtype))
    pat = jnp.concatenate(cols, axis=-1)              # (B, OH, OW, OD, K + k_pad)
    return pat.reshape(B * OH * OW * OD, -1), (OH, OW, OD)


def conv_embed_forward(x, weight, bias, gamma=None, beta=None, *,
                       kernel_size=3, stride=4, padding=2,
                       use_norm=False, eps=1e-5,
                       tile_m=512,
                       compute_dtype=jnp.bfloat16, out_dtype=None,
                       output_layout="ncdhw"):
    """ConvEmbed.forward.

    x: (B, Cin, H, W, D) -> (B, Cout, OH, OW, OD)           (output_layout="ncdhw")
                         -> (B, OH*OW*OD, Cout) token layout (output_layout="tokens")
    """
    B, Cin, H, W, D = x.shape
    Cout = weight.shape[0]
    out_dtype = x.dtype if out_dtype is None else out_dtype

    K = Cin * kernel_size ** 3
    Kp = _round_up(K, 128)            # lane-aligned contraction dim
    Np = _round_up(Cout, 128)         # lane-dense output channels (do NOT use 256)

    patches, (OH, OW, OD) = _im2col_3d_cl(x, kernel_size, stride, padding,
                                          compute_dtype, Kp - K)
    M = patches.shape[0]

    # Balanced M tiling: no near-empty last tile; >= 2 (even) tiles once M is
    # large enough for v7x's two TensorCores to share the "parallel" axis.
    n_m = max(1, -(-M // tile_m))
    if M > 1024:
        n_m = max(n_m, 2)
        if n_m % 2:
            n_m += 1
    tm = _round_up(-(-M // n_m), 8)
    Mp = tm * n_m
    if Mp > M:
        # TODO(synk): an in-kernel gather (pl.ANY + make_async_copy) would also
        # remove this last small row-pad copy of the patches matrix.
        patches = jnp.pad(patches, ((0, Mp - M), (0, 0)))

    # Weight as (K, Cout) with kernel-offset-major / Cin-minor rows to match
    # the channels-last im2col column order; zero-padded to (Kp, Np) so the
    # padded output lanes are exactly zero (keeps the LayerNorm exact).
    w2d = jnp.transpose(weight, (2, 3, 4, 1, 0)).reshape(K, Cout)
    w2d = jnp.pad(w2d.astype(compute_dtype), ((0, Kp - K), (0, Np - Cout)))

    # Single packed parameter block: row0=bias, row1=gamma, row2=beta,
    # row3=channel mask (1.0 on real channels), rows 4..7 = zero padding.
    if gamma is None:
        gamma = jnp.ones((Cout,), jnp.float32)
    if beta is None:
        beta = jnp.zeros((Cout,), jnp.float32)
    params = jnp.zeros((8, Np), jnp.float32)
    params = params.at[0, :Cout].set(bias.astype(jnp.float32))
    params = params.at[1, :Cout].set(gamma.astype(jnp.float32))
    params = params.at[2, :Cout].set(beta.astype(jnp.float32))
    params = params.at[3, :Cout].set(1.0)

    kern = functools.partial(_conv_embed_kernel, use_norm=use_norm,
                             eps=eps, inv_cout=1.0 / Cout)

    # VMEM request: double-buffered patch tiles, resident weight (counted x2
    # for head-room), packed params, double-buffered output tiles, slack.
    csize = jnp.dtype(compute_dtype).itemsize
    osize = jnp.dtype(out_dtype).itemsize
    needed = (2 * tm * Kp * csize
              + 2 * Kp * Np * csize
              + 2 * 8 * Np * 4
              + 2 * tm * Np * osize
              + (2 << 20))
    vmem_limit = int(min(max(needed, 8 << 20), _vmem_budget_bytes()))

    out = pl.pallas_call(
        kern,
        out_shape=jax.ShapeDtypeStruct((Mp, Np), out_dtype),
        grid_spec=pltpu.PrefetchScalarGridSpec(
            num_scalar_prefetch=0,
            grid=(n_m,),
            in_specs=[
                pl.BlockSpec((tm, Kp), lambda i: (i, 0)),   # patch tile
                pl.BlockSpec((Kp, Np), lambda i: (0, 0)),   # resident weight
                pl.BlockSpec((8, Np), lambda i: (0, 0)),    # packed params
            ],
            out_specs=pl.BlockSpec((tm, Np), lambda i: (i, 0)),
        ),
        compiler_params=pltpu.CompilerParams(
            dimension_semantics=("parallel",),
            vmem_limit_bytes=vmem_limit,
        ),
    )(patches, w2d, params)

    out = out[:M, :Cout]                      # 'b (h w d) c' (post-LN) layout
    if output_layout == "tokens":
        # What the VisionTransformer stage consumes directly — avoids the
        # channels-first transpose copy entirely.
        return out.reshape(B, OH * OW * OD, Cout)
    out = out.reshape(B, OH, OW, OD, Cout)
    return jnp.transpose(out, (0, 4, 1, 2, 3))     # (B, Cout, OH, OW, OD)


def _reference(x, weight, bias, gamma, beta, *, stride, padding, use_norm,
               eps, compute_dtype):
    """Pure-JAX reference using the same compute dtype (bf16 MXU, f32 acc)."""
    y = lax.conv_general_dilated(
        x.astype(compute_dtype), weight.astype(compute_dtype),
        window_strides=(stride,) * 3,
        padding=[(padding, padding)] * 3,
        dimension_numbers=("NCDHW", "OIDHW", "NCDHW"),
        preferred_element_type=jnp.float32)
    y = y + bias.reshape(1, -1, 1, 1, 1).astype(jnp.float32)
    if use_norm:
        mean = jnp.mean(y, axis=1, keepdims=True)
        var = jnp.mean((y - mean) ** 2, axis=1, keepdims=True)
        y = (y - mean) * lax.rsqrt(var + eps)
        y = y * gamma.reshape(1, -1, 1, 1, 1) + beta.reshape(1, -1, 1, 1, 1)
    return y.astype(x.dtype)


if __name__ == "__main__":
    key = jax.random.PRNGKey(0)
    ok = True

    # Config A mirrors Discriminator.conv3.patch_embed:
    #   ConvEmbed(k=3, in_chans=32, embed_dim=64, stride=2, padding=1, LayerNorm)
    # Config B is the ConvEmbed default (no norm).
    configs = [
        dict(B=2, Cin=32, Cout=64, S=8, k=3, s=2, p=1, use_norm=True),
        dict(B=2, Cin=3, Cout=64, S=8, k=3, s=4, p=2, use_norm=False),
    ]

    for cfg in configs:
        key, kx, kw, kb, kg, kbe = jax.random.split(key, 6)
        B, Cin, Cout, S = cfg["B"], cfg["Cin"], cfg["Cout"], cfg["S"]
        k, s, p = cfg["k"], cfg["s"], cfg["p"]

        x = jax.random.normal(kx, (B, Cin, S, S, S), jnp.float32)
        weight = jax.random.normal(kw, (Cout, Cin, k, k, k), jnp.float32) * 0.1
        bias = jax.random.normal(kb, (Cout,), jnp.float32) * 0.1
        gamma = 1.0 + 0.1 * jax.random.normal(kg, (Cout,), jnp.float32)
        beta = 0.1 * jax.random.normal(kbe, (Cout,), jnp.float32)

        out = conv_embed_forward(x, weight, bias, gamma, beta,
                                 kernel_size=k, stride=s, padding=p,
                                 use_norm=cfg["use_norm"])
        out = jax.block_until_ready(out)

        ref = _reference(x, weight, bias, gamma, beta,
                         stride=s, padding=p, use_norm=cfg["use_norm"],
                         eps=1e-5, compute_dtype=jnp.bfloat16)

        o_sp = (S + 2 * p - k) // s + 1
        assert out.shape == (B, Cout, o_sp, o_sp, o_sp), out.shape
        ok = ok and bool(jnp.allclose(out, ref, atol=2e-2, rtol=2e-2))

        # Also exercise the token-layout output (what VisionTransformer eats).
        tok = conv_embed_forward(x, weight, bias, gamma, beta,
                                 kernel_size=k, stride=s, padding=p,
                                 use_norm=cfg["use_norm"],
                                 output_layout="tokens")
        tok = jax.block_until_ready(tok)
        ref_tok = jnp.transpose(ref, (0, 2, 3, 4, 1)).reshape(B, -1, Cout)
        ok = ok and bool(jnp.allclose(tok, ref_tok, atol=2e-2, rtol=2e-2))

    print("KERNEL_OK" if ok else "KERNEL_MISMATCH")
</pallas_src>

<mosaic_0001>
module attributes {stable_mosaic.version = 11 : i64} {
  func.func @_conv_embed_kernel(%arg0: i32, %arg1: memref<128x896xbf16, #tpu.memory_space<vmem>>, %arg2: memref<896x128xbf16, #tpu.memory_space<vmem>>, %arg3: memref<8x128xf32, #tpu.memory_space<vmem>>, %arg4: memref<128x128xf32, #tpu.memory_space<vmem>>) attributes {dimension_semantics = [#tpu.dimension_semantics<parallel>], iteration_bounds = array<i64: 1>, scalar_prefetch = 0 : i64, scratch_operands = 0 : i64, tpu.core_type = #tpu.core_type<tc>, window_params = [{transform_indices = @transform_0, window_bounds = array<i64: 128, 896>}, {pipeline_mode = #tpu.pipeline_mode<synchronous>, transform_indices = @transform_1, window_bounds = array<i64: 896, 128>}, {pipeline_mode = #tpu.pipeline_mode<synchronous>, transform_indices = @transform_2, window_bounds = array<i64: 8, 128>}, {transform_indices = @transform_3, window_bounds = array<i64: 128, 128>}]} {
    %c0 = arith.constant 0 : index
    %c0_0 = arith.constant 0 : index
    %0 = vector.load %arg1[%c0, %c0_0] : memref<128x896xbf16, #tpu.memory_space<vmem>>, vector<128x896xbf16>
    %c0_1 = arith.constant 0 : index
    %c0_2 = arith.constant 0 : index
    %1 = vector.load %arg2[%c0_1, %c0_2] : memref<896x128xbf16, #tpu.memory_space<vmem>>, vector<896x128xbf16>
    %cst = arith.constant dense<0.000000e+00> : vector<128x128xf32>
    %2 = tpu.matmul %0, %1, %cst {dimension_numbers = #tpu.dot_dimension_numbers<[1], [0], [0], [1], [0, 0, 1, 1], [], []>} : vector<128x896xbf16>, vector<896x128xbf16>, vector<128x128xf32> -> vector<128x128xf32>
    %c0_3 = arith.constant 0 : index
    %c0_4 = arith.constant 0 : index
    %3 = vector.load %arg3[%c0_3, %c0_4] : memref<8x128xf32, #tpu.memory_space<vmem>>, vector<1x128xf32>
    %4 = vector.broadcast %3 : vector<1x128xf32> to vector<128x128xf32>
    %5 = arith.addf %2, %4 : vector<128x128xf32>
    %c1 = arith.constant 1 : index
    %c0_5 = arith.constant 0 : index
    %6 = vector.load %arg3[%c1, %c0_5] : memref<8x128xf32, #tpu.memory_space<vmem>>, vector<1x128xf32>
    %c2 = arith.constant 2 : index
    %c0_6 = arith.constant 0 : index
    %7 = vector.load %arg3[%c2, %c0_6] : memref<8x128xf32, #tpu.memory_space<vmem>>, vector<1x128xf32>
    %c3 = arith.constant 3 : index
    %c0_7 = arith.constant 0 : index
    %8 = vector.load %arg3[%c3, %c0_7] : memref<8x128xf32, #tpu.memory_space<vmem>>, vector<1x128xf32>
    %cst_8 = arith.constant dense<0.000000e+00> : vector<128xf32>
    %9 = vector.multi_reduction <add>, %5, %cst_8 [1] : vector<128x128xf32> to vector<128xf32>
    %10 = vector.shape_cast %9 : vector<128xf32> to vector<128x1xf32>
    %cst_9 = arith.constant 1.562500e-02 : f32
    %11 = vector.broadcast %cst_9 : f32 to vector<128x1xf32>
    %12 = arith.mulf %10, %11 : vector<128x1xf32>
    %13 = vector.broadcast %12 : vector<128x1xf32> to vector<128x128xf32>
    %14 = arith.subf %5, %13 : vector<128x128xf32>
    %15 = vector.broadcast %8 : vector<1x128xf32> to vector<128x128xf32>
    %16 = arith.mulf %14, %15 : vector<128x128xf32>
    %17 = arith.mulf %16, %16 : vector<128x128xf32>
    %cst_10 = arith.constant dense<0.000000e+00> : vector<128xf32>
    %18 = vector.multi_reduction <add>, %17, %cst_10 [1] : vector<128x128xf32> to vector<128xf32>
    %19 = vector.shape_cast %18 : vector<128xf32> to vector<128x1xf32>
    %cst_11 = arith.constant 1.562500e-02 : f32
    %20 = vector.broadcast %cst_11 : f32 to vector<128x1xf32>
    %21 = arith.mulf %19, %20 : vector<128x1xf32>
    %cst_12 = arith.constant 9.99999974E-6 : f32
    %22 = vector.broadcast %cst_12 : f32 to vector<128x1xf32>
    %23 = arith.addf %21, %22 : vector<128x1xf32>
    %24 = math.rsqrt %23 : vector<128x1xf32>
    %25 = vector.broadcast %24 : vector<128x1xf32> to vector<128x128xf32>
    %26 = vector.broadcast %6 : vector<1x128xf32> to vector<128x128xf32>
    %27 = arith.mulf %25, %26 : vector<128x128xf32>
    %28 = arith.mulf %14, %27 : vector<128x128xf32>
    %29 = vector.broadcast %7 : vector<1x128xf32> to vector<128x128xf32>
    %30 = arith.addf %28, %29 : vector<128x128xf32>
    %c0_13 = arith.constant 0 : index
    %c0_14 = arith.constant 0 : index
    %31 = vector.load %arg4[%c0_13, %c0_14] : memref<128x128xf32, #tpu.memory_space<vmem>>, vector<128x128xf32>
    tpu.vector_store %arg4[%c0_13, %c0_14], %30 {strides = array<i32>} : memref<128x128xf32, #tpu.memory_space<vmem>>, vector<128x128xf32>,
    return
  }
  func.func @transform_0(%arg0: i32) -> (i32, i32) {
    %c0_i32 = arith.constant 0 : i32
    %c0_i32_0 = arith.constant 0 : i32
    return %arg0, %c0_i32 : i32, i32
  }
  func.func @transform_1(%arg0: i32) -> (i32, i32) {
    %c0_i32 = arith.constant 0 : i32
    %c0_i32_0 = arith.constant 0 : i32
    %c0_i32_1 = arith.constant 0 : i32
    return %c0_i32, %c0_i32_0 : i32, i32
  }
  func.func @transform_2(%arg0: i32) -> (i32, i32) {
    %c0_i32 = arith.constant 0 : i32
    %c0_i32_0 = arith.constant 0 : i32
    %c0_i32_1 = arith.constant 0 : i32
    return %c0_i32, %c0_i32_0 : i32, i32
  }
  func.func @transform_3(%arg0: i32) -> (i32, i32) {
    %c0_i32 = arith.constant 0 : i32
    %c0_i32_0 = arith.constant 0 : i32
    return %arg0, %c0_i32 : i32, i32
  }
}

</mosaic_0001>

<bundles_post_ra>
// kernel: tpu_custom_call.1
= control target key start
LH: loop header
LB: loop body
LE: loop exit
PB: predicated region body
PF: predicated region fallthrough
CT: control target
= control target key end

     0   :  { %8 = vsyncpa [#allocation3], 0  ;;  %s2475_s0 = inlined_call_operand.hbm [shape: bf16[128,896], index: 0, kind: input, shape index: {}]   ;;  %s2476_s1 = inlined_call_operand.hbm [shape: bf16[896,128], index: 1, kind: input, shape index: {}]   ;;  %s2477_s2 = inlined_call_operand.hbm [shape: f32[8,128], index: 2, kind: input, shape index: {}]   ;;  %s2478_s3 = inlined_call_operand.hbm [shape: f32[128,128], index: 3, kind: output, shape index: {}]  }
   0x1   :  { %9 = vsyncpa [#allocation6], 0 }
   0x2   :  { %10 = vsyncpa [#allocation4], 0  ;;  %s2149_s12 = smov [#allocation5]   ;;  %s2055_s16 = scalar_lea.hbm %s2476_s1, 7168 }
   0x3   :  { %s28_s13 = sshll.u32 %s2149_s12, 4  ;;  %p2056_p0 = scmp.ne.s32.totalorder %s2476_s1, %s2055_s16  ;;  %s29_s13 = int_to_ptr.vmem [resolvable:$true] %s28_s13 }
   0x4   :  { %p2059_p1 = scmp.lt.u32.totalorder %s2055_s16, %s2476_s1 }
   0x6   :  { %p2061_p2 = pnand %p2059_p1, %p2056_p0 }
   0x8   :  { %2064 = shalt.err (!%p2061_p2)
}
   0x9   :  { %s2065_s21 = scalar_lea.vmem %s29_s13, 7168  ;;  %p2070_p4 = scmp.lt.s32.totalorder %s29_s13, %s29_s13 }
   0xa   :  { %p2066_p3 = scmp.ne.s32.totalorder %s29_s13, %s2065_s21  ;;  %p2071_p5 = scmp.lt.s32.totalorder %s2065_s21, %s2065_s21 }
   0xc   :  { %p2072_p6 = por %p2071_p5, %p2070_p4 }
   0xe   :  { %p2073_p7 = pnand %p2072_p6, %p2066_p3 }
  0x10   :  { %2076 = shalt.err (!%p2073_p7)
}
  0x11   :  { %s2150_s22 = smov 64   ;;  %s2151_s23 = smov 4  }
  0x12   :  { %34 = dma.hbm_to_vmem [thread:$0]  %s2476_s1, 7168, %s29_s13, [#allocation6], %s2150_s22, %s2150_s22, %s2151_s23  }
  0x13   :  { %s2152_s26 = smov [#allocation2]   ;;  %s2077_s30 = scalar_lea.hbm %s2475_s0, 7168 }
  0x14   :  { %s16_s27 = sshll.u32 %s2152_s26, 4  ;;  %p2078_p8 = scmp.ne.s32.totalorder %s2475_s0, %s2077_s30  ;;  %s17_s27 = int_to_ptr.vmem [resolvable:$true] %s16_s27 }
  0x15   :  { %p2081_p9 = scmp.lt.u32.totalorder %s2077_s30, %s2475_s0 }
  0x17   :  { %p2083_p10 = pnand %p2081_p9, %p2078_p8 }
  0x19   :  { %2086 = shalt.err (!%p2083_p10)
}
  0x1a   :  { %s2087_s8 = scalar_lea.vmem %s17_s27, 7168  ;;  %p2092_p12 = scmp.lt.s32.totalorder %s17_s27, %s17_s27 }
  0x1b   :  { %p2088_p11 = scmp.ne.s32.totalorder %s17_s27, %s2087_s8  ;;  %p2093_p13 = scmp.lt.s32.totalorder %s2087_s8, %s2087_s8 }
  0x1d   :  { %p2094_p0 = por %p2093_p13, %p2092_p12 }
  0x1f   :  { %p2095_p1 = pnand %p2094_p0, %p2088_p11 }
  0x21   :  { %2098 = shalt.err (!%p2095_p1)
}
  0x22   :  { %s2153_s1 = smov 448   ;;  %s2154_s9 = smov 28  }
  0x23   :  { %22 = dma.hbm_to_vmem [thread:$0]  %s2475_s0, 7168, %s17_s27, [#allocation3], %s2153_s1, %s2153_s1, %s2154_s9  }
  0x24   :  { %s2155_s12 = smov [#allocation7]   ;;  %s2099_s16 = scalar_lea.hbm %s2477_s2, 128 }
  0x25   :  { %s41_s13 = sshll.u32 %s2155_s12, 4  ;;  %p2100_p2 = scmp.ne.s32.totalorder %s2477_s2, %s2099_s16  ;;  %s42_s13 = int_to_ptr.vmem [resolvable:$true] %s41_s13 }
  0x26   :  { %p2103_p3 = scmp.lt.u32.totalorder %s2099_s16, %s2477_s2 }
  0x28   :  { %p2105_p4 = pnand %p2103_p3, %p2100_p2 }
  0x2a   :  { %2108 = shalt.err (!%p2105_p4)
}
  0x2b   :  { %s2109_s21 = scalar_lea.vmem %s42_s13, 128  ;;  %p2114_p6 = scmp.lt.s32.totalorder %s42_s13, %s42_s13 }
  0x2c   :  { %p2110_p5 = scmp.ne.s32.totalorder %s42_s13, %s2109_s21  ;;  %p2115_p7 = scmp.lt.s32.totalorder %s2109_s21, %s2109_s21 }
  0x2e   :  { %p2116_p8 = por %p2115_p7, %p2114_p6 }
  0x30   :  { %p2117_p9 = pnand %p2116_p8, %p2110_p5 }
  0x32   :  { %2120 = shalt.err (!%p2117_p9)
}
  0x33   :  { %44 = dma.hbm_to_vmem [thread:$0]  %s2477_s2, 128, %s42_s13, [#allocation6]  }
  0x34   :  { %2143 = dma.done.wait [#allocation3], 7168  }
  0x35   :  { %2144 = vsyncadd [#allocation3], 4294960128 }
  0x36   :  { %2145 = dma.done.wait [#allocation6], 7296  }
  0x37   :  { %2146 = vsyncadd [#allocation6], 4294960000  ;;  %v1887_v0 = vld [vmem:[#allocation5 + $0x40] sm:$0xff]   ;;  %v1891_v4 = vld [vmem:[#allocation5 + $0x48] sm:$0xff]   ;;  %s2156_s2 = smov [#allocation8]  }
  0x38   :  { %v1888_v1 = vld [vmem:[#allocation5] sm:$0xff]   ;;  %1637 = vmatprep.subr.bf16.mxu0 %v1887_v0  ;;  %v1892_v5 = vld [vmem:[#allocation5 + $0x8] sm:$0xff]   ;;  %v1895_v8 = vld [vmem:[#allocation5 + $0x50] sm:$0xff]   ;;  %s1508_s23 = sshll.u32 %s2156_s2, 4  ;;  %s1509_s23 = int_to_ptr.vmem [resolvable:$true] %s1508_s23 }
  0x39   :  { %v1889_v2 = vld [vmem:[#allocation5 + $0xc0] sm:$0xff]   ;;  %1638 = vmatpush3.bf16.msra.mxu0 %v1888_v1  ;;  %v1893_v6 = vld [vmem:[#allocation5 + $0xc8] sm:$0xff]   ;;  %v1896_v9 = vld [vmem:[#allocation5 + $0x10] sm:$0xff]   ;;  %s2121_s24 = scalar_lea.vmem %s1509_s23, 2048  ;;  %p2126_p11 = scmp.lt.s32.totalorder %s1509_s23, %s1509_s23 }
  0x3a   :  { %v1890_v3 = vld [vmem:[#allocation5 + $0x80] sm:$0xff]   ;;  %1701 = vmatprep.subr.bf16.mxu1 %v1889_v2  ;;  %1639 = vmatprep.subr.bf16.mxu0 %v1891_v4  ;;  %v1894_v7 = vld [vmem:[#allocation5 + $0x88] sm:$0xff]   ;;  %v1897_v10 = vld [vmem:[#allocation5 + $0xd0] sm:$0xff]   ;;  %p2122_p10 = scmp.ne.s32.totalorder %s1509_s23, %s2121_s24  ;;  %p2127_p12 = scmp.lt.s32.totalorder %s2121_s24, %s2121_s24 }
  0x3b   :  { %1702 = vmatpush3.bf16.msra.mxu1 %v1890_v3  ;;  %v1898_v11 = vld [vmem:[#allocation5 + $0x90] sm:$0xff]   ;;  %v1899_v12 = vld [vmem:[#allocation5 + $0x58] sm:$0xff]   ;;  %v1903_v16 = vld [vmem:[#allocation5 + $0x60] sm:$0xff]  }
  0x3c   :  { %1703 = vmatprep.subr.bf16.mxu1 %v1893_v6  ;;  %v1900_v13 = vld [vmem:[#allocation5 + $0x18] sm:$0xff]   ;;  %v1904_v17 = vld [vmem:[#allocation5 + $0x20] sm:$0xff]   ;;  %v1907_v20 = vld [vmem:[#allocation5 + $0x68] sm:$0xff]   ;;  %p2128_p13 = por %p2127_p12, %p2126_p11 }
  0x3d   :  { %1640 = vmatpush3.bf16.msra.mxu0 %v1892_v5  ;;  %v1901_v14 = vld [vmem:[#allocation5 + $0xd8] sm:$0xff]   ;;  %v1905_v18 = vld [vmem:[#allocation5 + $0xe0] sm:$0xff]   ;;  %v1908_v21 = vld [vmem:[#allocation5 + $0x28] sm:$0xff]  }
  0x3e   :  { %1641 = vmatprep.subr.bf16.mxu0 %v1895_v8  ;;  %v1902_v15 = vld [vmem:[#allocation5 + $0x98] sm:$0xff]   ;;  %v1906_v19 = vld [vmem:[#allocation5 + $0xa0] sm:$0xff]   ;;  %v1909_v22 = vld [vmem:[#allocation5 + $0xe8] sm:$0xff]   ;;  %p2129_p0 = pnand %p2128_p13, %p2122_p10 }
  0x3f   :  { %1704 = vmatpush3.bf16.msra.mxu1 %v1894_v7  ;;  %v1910_v23 = vld [vmem:[#allocation5 + $0xa8] sm:$0xff]   ;;  %v1911_v24 = vld [vmem:[#allocation5 + $0x70] sm:$0xff]   ;;  %v1915_v28 = vld [vmem:[#allocation5 + $0x78] sm:$0xff]  }
  0x40   :  { %1705 = vmatprep.subr.bf16.mxu1 %v1897_v10  ;;  %v1912_v25 = vld [vmem:[#allocation5 + $0x30] sm:$0xff]   ;;  %v1916_v29 = vld [vmem:[#allocation5 + $0x38] sm:$0xff]   ;;  %v1920_v32 = vld [vmem:[#allocation2 + $0x4] ss:$28 sps:$4 sm:$0xff]  }
  0x41   :  { %1642 = vmatpush3.bf16.msra.mxu0 %v1896_v9  ;;  %v1913_v26 = vld [vmem:[#allocation5 + $0xf0] sm:$0xff]   ;;  %v1917_v30 = vld [vmem:[#allocation5 + $0xf8] sm:$0xff]   ;;  %892 = vmatprep.mubr.bf16.mxu0 %v1920_v32  ;;  %v1922_v34 = vld [vmem:[#allocation5 + $0x140] sm:$0xff]  }
  0x42   :  { %1643 = vmatprep.subr.bf16.mxu0 %v1899_v12  ;;  %v1914_v27 = vld [vmem:[#allocation5 + $0xb0] sm:$0xff]   ;;  %v1918_v31 = vld [vmem:[#allocation2] ss:$28 sps:$4 sm:$0xff]   ;;  %v1923_v35 = vld [vmem:[#allocation2 + $0x8] ss:$28 sps:$4 sm:$0xff]  }
  0x43   :  { %1706 = vmatpush3.bf16.msra.mxu1 %v1898_v11  ;;  %v1921_v33 = vld [vmem:[#allocation5 + $0xb8] sm:$0xff]   ;;  %v1925_v36 = vld [vmem:[#allocation2 + $0xc] ss:$28 sps:$4 sm:$0xff]   ;;  %v1926_v37 = vld [vmem:[#allocation5 + $0x100] sm:$0xff]  }
  0x44   :  { %1707 = vmatprep.subr.bf16.mxu1 %v1901_v14  ;;  %989 = vmatprep.mubr.bf16.mxu1 %v1925_v36  ;;  %v1927_v38 = vld [vmem:[#allocation2 + $0x3c] ss:$28 sps:$4 sm:$0xff]   ;;  %v1930_v40 = vld [vmem:[#allocation5 + $0x148] sm:$0xff]   ;;  %v1931_v41 = vld [vmem:[#allocation2 + $0x44] ss:$28 sps:$4 sm:$0xff]  }
  0x45   :  { %1644 = vmatpush3.bf16.msra.mxu0 %v1900_v13  ;;  %v1929_v39 = vld [vmem:[#allocation2 + $0x38] ss:$28 sps:$4 sm:$0xff]   ;;  %v1933_v42 = vld [vmem:[#allocation5 + $0x108] sm:$0xff]   ;;  %v1934_v43 = vld [vmem:[#allocation2 + $0x40] ss:$28 sps:$4 sm:$0xff]  }
  0x46   :  { %1645 = vmatprep.subr.bf16.mxu0 %v1903_v16  ;;  %v1935_v44 = vld [vmem:[#allocation2 + $0x74] ss:$28 sps:$4 sm:$0xff]   ;;  %v1939_v46 = vld [vmem:[#allocation2 + $0x7c] ss:$28 sps:$4 sm:$0xff]   ;;  %v1943_v49 = vld [vmem:[#allocation2 + $0xac] ss:$28 sps:$4 sm:$0xff]  }
  0x47   :  { %1708 = vmatpush3.bf16.msra.mxu1 %v1902_v15  ;;  %v1938_v45 = vld [vmem:[#allocation5 + $0x150] sm:$0xff]   ;;  %v1946_v50 = vld [vmem:[#allocation5 + $0x158] sm:$0xff]   ;;  %v1951_v54 = vld [vmem:[#allocation5 + $0x180] sm:$0xff]  }
  0x48   :  { %1709 = vmatprep.subr.bf16.mxu1 %v1905_v18  ;;  %v1941_v47 = vld [vmem:[#allocation5 + $0x110] sm:$0xff]   ;;  %v1949_v53 = vld [vmem:[#allocation5 + $0x118] sm:$0xff]   ;;  %v1955_v55 = vld [vmem:[#allocation5 + $0x160] sm:$0xff]  }
  0x49   :  { %1646 = vmatpush3.bf16.msra.mxu0 %v1904_v17  ;;  %v1937_v48 = vld [vmem:[#allocation2 + $0x70] ss:$28 sps:$4 sm:$0xff]   ;;  %v1942_v51 = vld [vmem:[#allocation2 + $0x78] ss:$28 sps:$4 sm:$0xff]   ;;  %v1945_v56 = vld [vmem:[#allocation2 + $0xa8] ss:$28 sps:$4 sm:$0xff]  }
  0x4a   :  { %1647 = vmatprep.subr.bf16.mxu0 %v1907_v20  ;;  %v1947_v52 = vld [vmem:[#allocation2 + $0xb4] ss:$28 sps:$4 sm:$0xff]   ;;  %v1958_v57 = vld [vmem:[#allocation5 + $0x120] sm:$0xff]   ;;  %v1960_v59 = vld [vmem:[#allocation5 + $0x188] sm:$0xff]  }
  0x4b   :  { %1710 = vmatpush3.bf16.msra.mxu1 %v1906_v19  ;;  %v1952_v58 = vld [vmem:[#allocation2 + $0xe4] ss:$28 sps:$4 sm:$0xff]   ;;  %v1950_v60 = vld [vmem:[#allocation2 + $0xb0] ss:$28 sps:$4 sm:$0xff]   ;;  %v1961_v3 = vld [vmem:[#allocation2 + $0x11c] ss:$28 sps:$4 sm:$0xff]  }
  0x4c   :  { %1711 = vmatprep.subr.bf16.mxu1 %v1909_v22  ;;  %v1956_v61 = vld [vmem:[#allocation2 + $0xec] ss:$28 sps:$4 sm:$0xff]   ;;  %v1969_v0 = vld [vmem:[#allocation5 + $0x190] sm:$0xff]   ;;  %v1954_v1 = vld [vmem:[#allocation2 + $0xe0] ss:$28 sps:$4 sm:$0xff]  }
  0x4d   :  { %1648 = vmatpush3.bf16.msra.mxu0 %v1908_v21  ;;  %v1964_v62 = vld [vmem:[#allocation5 + $0x168] sm:$0xff]   ;;  %v1973_v4 = vld [vmem:[#allocation5 + $0x170] sm:$0xff]   ;;  %v1974_v5 = vld [vmem:[#allocation5 + $0x198] sm:$0xff]  }
  0x4e   :  { %1649 = vmatprep.subr.bf16.mxu0 %v1911_v24  ;;  %v1967_v63 = vld [vmem:[#allocation5 + $0x128] sm:$0xff]   ;;  %v1965_v6 = vld [vmem:[#allocation2 + $0x124] ss:$28 sps:$4 sm:$0xff]   ;;  %v1977_v7 = vld [vmem:[#allocation5 + $0x130] sm:$0xff]  }
  0x4f   :  { %1712 = vmatpush3.bf16.msra.mxu1 %v1910_v23  ;;  %v1959_v2 = vld [vmem:[#allocation2 + $0xe8] ss:$28 sps:$4 sm:$0xff]   ;;  %v1963_v9 = vld [vmem:[#allocation2 + $0x118] ss:$28 sps:$4 sm:$0xff]   ;;  %v1968_v13 = vld [vmem:[#allocation2 + $0x120] ss:$28 sps:$4 sm:$0xff]  }
  0x50   :  { %1713 = vmatprep.subr.bf16.mxu1 %v1913_v26  ;;  %v1979_v8 = vld [vmem:[#allocation5 + $0x1a0] sm:$0xff]   ;;  %v1970_v10 = vld [vmem:[#allocation2 + $0x154] ss:$28 sps:$4 sm:$0xff]   ;;  %v1983_v11 = vld [vmem:[#allocation5 + $0x178] sm:$0xff]  }
  0x51   :  { %1650 = vmatpush3.bf16.msra.mxu0 %v1912_v25  ;;  %v1984_v12 = vld [vmem:[#allocation5 + $0x1a8] sm:$0xff]   ;;  %v1987_v14 = vld [vmem:[#allocation5 + $0x138] sm:$0xff]   ;;  %v1989_v16 = vld [vmem:[#allocation5 + $0x1b0] sm:$0xff]  }
  0x52   :  { %1651 = vmatprep.subr.bf16.mxu0 %v1915_v28  ;;  %v1975_v15 = vld [vmem:[#allocation2 + $0x15c] ss:$28 sps:$4 sm:$0xff]   ;;  %v1972_v18 = vld [vmem:[#allocation2 + $0x150] ss:$28 sps:$4 sm:$0xff]   ;;  %v1982_v22 = vld [vmem:[#allocation2 + $0x188] ss:$28 sps:$4 sm:$0xff]  }
  0x53   :  { %1714 = vmatpush3.bf16.msra.mxu1 %v1914_v27  ;;  %v1993_v17 = vld [vmem:[#allocation5 + $0x1b8] sm:$0xff]   ;;  %v1980_v19 = vld [vmem:[#allocation2 + $0x18c] ss:$28 sps:$4 sm:$0xff]   ;;  %v1985_v21 = vld [vmem:[#allocation2 + $0x194] ss:$28 sps:$4 sm:$0xff]  }
  0x54   :  { %1715 = vmatprep.subr.bf16.mxu1 %v1917_v30  ;;  %v1978_v20 = vld [vmem:[#allocation2 + $0x158] ss:$28 sps:$4 sm:$0xff]   ;;  %v1988_v24 = vld [vmem:[#allocation2 + $0x190] ss:$28 sps:$4 sm:$0xff]   ;;  %v1998_v30 = vld [vmem:[#allocation2 + $0x48] ss:$28 sps:$4 sm:$0xff]  }
  0x55   :  { %1652 = vmatpush3.bf16.msra.mxu0 %v1916_v29  ;;  %v1992_v23 = vld [vmem:[#allocation2 + $0x14] ss:$28 sps:$4 sm:$0xff]   ;;  %v1996_v27 = vld [vmem:[#allocation2 + $0x4c] ss:$28 sps:$4 sm:$0xff]   ;;  %v2003_v32 = vld [vmem:[#allocation2 + $0xc0] ss:$28 sps:$4 sm:$0xff]  }
  0x56   :  { %1765 = vmatprep.subr.bf16.mxu0 %v1922_v34  ;;  %v1994_v25 = vld [vmem:[#allocation2 + $0x18] ss:$28 sps:$4 sm:$0xff]   ;;  %v1990_v26 = vld [vmem:[#allocation2 + $0x10] ss:$28 sps:$4 sm:$0xff]   ;;  %v2002_v29 = vld [vmem:[#allocation2 + $0x88] ss:$28 sps:$4 sm:$0xff]  }
  0x57   :  { %1716 = vmatpush3.bf16.msra.mxu1 %v1921_v33  ;;  %v1995_v28 = vld [vmem:[#allocation2 + $0x50] ss:$28 sps:$4 sm:$0xff]   ;;  %v2010_v33 = vld [vmem:[#allocation2 + $0xf8] ss:$28 sps:$4 sm:$0xff]   ;;  %v2001_v34 = vld [vmem:[#allocation2 + $0x80] ss:$28 sps:$4 sm:$0xff]  }
  0x58   :  { %893 = vmatmul.mubr.bf16.vlgmr.msra.gmra.mrb[0].mxu0 %v1918_v31  ;;  %1845 = vmatprep.subr.bf16.mxu1 %v1951_v54  ;;  %v1999_v31 = vld [vmem:[#allocation2 + $0x84] ss:$28 sps:$4 sm:$0xff]   ;;  %v2011_v36 = vld [vmem:[#allocation2 + $0x130] ss:$28 sps:$4 sm:$0xff]  }
  0x59   :  { %1766 = vmatpush3.bf16.msra.mxu0 %v1926_v37  ;;  %900 = vmatprep.mubr.bf16.mxu0 %v1927_v38  ;;  %v2018_v37 = vld [vmem:[#allocation2 + $0x168] ss:$28 sps:$4 sm:$0xff]   ;;  %v2006_v38 = vld [vmem:[#allocation2 + $0xb8] ss:$28 sps:$4 sm:$0xff]  }
  0x5a   :  { %990 = vmatmul.mubr.bf16.vlgmr.msra.gmra.mrb[0].mxu1 %v1923_v35  ;;  %1767 = vmatprep.subr.bf16.mxu0 %v1930_v40  ;;  %v2004_v35 = vld [vmem:[#allocation2 + $0xbc] ss:$28 sps:$4 sm:$0xff]  }
  0x5b   :  { %997 = vmatprep.mubr.bf16.mxu1 %v1931_v41  ;;  %1846 = vmatpush3.bf16.msra.mxu1 %v1951_v54  ;;  %v2019_v40 = vld [vmem:[#allocation2 + $0x1a0] ss:$28 sps:$4 sm:$0xff]   ;;  %v2009_v41 = vld [vmem:[#allocation2 + $0xf0] ss:$28 sps:$4 sm:$0xff]  }
  0x5c   :  { %1847 = vmatprep.subr.bf16.mxu1 %v1960_v59 }
  0x5d   :  { %1768 = vmatpush3.bf16.msra.mxu0 %v1933_v42  ;;  %v2012_v42 = vld [vmem:[#allocation2 + $0x12c] ss:$28 sps:$4 sm:$0xff]  }
  0x5e   :  { %1769 = vmatprep.subr.bf16.mxu0 %v1938_v45  ;;  %v2017_v45 = vld [vmem:[#allocation2 + $0x160] ss:$28 sps:$4 sm:$0xff]  }
  0x5f   :  { %1848 = vmatpush3.bf16.msra.mxu1 %v1960_v59 }
  0x60   :  { %901 = vmatmul.mubr.bf16.gmra.mrb[4].mxu0 %v1929_v39  ;;  %1849 = vmatprep.subr.bf16.mxu1 %v1969_v0  ;;  %v2007_v39 = vld [vmem:[#allocation2 + $0xf4] ss:$28 sps:$4 sm:$0xff]  }
  0x61   :  { %908 = vmatprep.mubr.bf16.mxu0 %v1935_v44  ;;  %1770 = vmatpush3.bf16.msra.mxu0 %v1941_v47  ;;  %v2015_v44 = vld [vmem:[#allocation2 + $0x164] ss:$28 sps:$4 sm:$0xff]   ;;  %v2022_v47 = vld [vmem:[#allocation2 + $0x198] ss:$28 sps:$4 sm:$0xff]  }
  0x62   :  { %998 = vmatmul.mubr.bf16.gmra.mrb[4].mxu1 %v1934_v43  ;;  %1771 = vmatprep.subr.bf16.mxu0 %v1946_v50  ;;  %v2014_v43 = vld [vmem:[#allocation2 + $0x128] ss:$28 sps:$4 sm:$0xff]  }
  0x63   :  { %1005 = vmatprep.mubr.bf16.mxu1 %v1939_v46  ;;  %1850 = vmatpush3.bf16.msra.mxu1 %v1969_v0  ;;  %v2020_v46 = vld [vmem:[#allocation2 + $0x19c] ss:$28 sps:$4 sm:$0xff]  }
  0x64   :  { %1851 = vmatprep.subr.bf16.mxu1 %v1974_v5 }
  0x65   :  { %1772 = vmatpush3.bf16.msra.mxu0 %v1949_v53 }
  0x66   :  { %1773 = vmatprep.subr.bf16.mxu0 %v1955_v55 }
  0x67   :  { %1852 = vmatpush3.bf16.msra.mxu1 %v1974_v5 }
  0x68   :  { %909 = vmatmul.mubr.bf16.gmra.mrb[8].mxu0 %v1937_v48  ;;  %1853 = vmatprep.subr.bf16.mxu1 %v1979_v8 }
  0x69   :  { %916 = vmatprep.mubr.bf16.mxu0 %v1943_v49  ;;  %1774 = vmatpush3.bf16.msra.mxu0 %v1958_v57  ;;  %v2215_v49 = vld [vmem:[#allocation7] ss:$0 sm:$0xff] }
  0x6a   :  { %1006 = vmatmul.mubr.bf16.gmra.mrb[8].mxu1 %v1942_v51  ;;  %1775 = vmatprep.subr.bf16.mxu0 %v1964_v62 }
  0x6b   :  { %1013 = vmatprep.mubr.bf16.mxu1 %v1947_v52  ;;  %1854 = vmatpush3.bf16.msra.mxu1 %v1979_v8 }
  0x6c   :  { %1855 = vmatprep.subr.bf16.mxu1 %v1984_v12 }
  0x6d   :  { %1776 = vmatpush3.bf16.msra.mxu0 %v1967_v63 }
  0x6e   :  { %1777 = vmatprep.subr.bf16.mxu0 %v1973_v4 }
  0x6f   :  { %1856 = vmatpush3.bf16.msra.mxu1 %v1984_v12 }
  0x70   :  { %917 = vmatmul.mubr.bf16.gmra.mrb[12].mxu0 %v1945_v56  ;;  %1857 = vmatprep.subr.bf16.mxu1 %v1989_v16 }
  0x71   :  { %924 = vmatprep.mubr.bf16.mxu0 %v1952_v58  ;;  %1778 = vmatpush3.bf16.msra.mxu0 %v1977_v7 }
  0x72   :  { %1014 = vmatmul.mubr.bf16.gmra.mrb[12].mxu1 %v1950_v60  ;;  %1779 = vmatprep.subr.bf16.mxu0 %v1983_v11 }
  0x73   :  { %1021 = vmatprep.mubr.bf16.mxu1 %v1956_v61  ;;  %1858 = vmatpush3.bf16.msra.mxu1 %v1989_v16 }
  0x74   :  { %1859 = vmatprep.subr.bf16.mxu1 %v1993_v17 }
  0x75   :  { %1780 = vmatpush3.bf16.msra.mxu0 %v1987_v14 }
  0x77   :  { %1860 = vmatpush3.bf16.msra.mxu1 %v1993_v17 }
  0x78   :  { %925 = vmatmul.mubr.bf16.gmra.mrb[16].mxu0 %v1954_v1 }
  0x79   :  { %932 = vmatprep.mubr.bf16.mxu0 %v1961_v3 }
  0x7a   :  { %1022 = vmatmul.mubr.bf16.gmra.mrb[16].mxu1 %v1959_v2 }
  0x7b   :  { %1029 = vmatprep.mubr.bf16.mxu1 %v1965_v6 }
  0x80   :  { %933 = vmatmul.mubr.bf16.gmra.mrb[20].mxu0 %v1963_v9 }
  0x81   :  { %940 = vmatprep.mubr.bf16.mxu0 %v1970_v10 }
  0x82   :  { %1030 = vmatmul.mubr.bf16.gmra.mrb[20].mxu1 %v1968_v13 }
  0x83   :  { %1037 = vmatprep.mubr.bf16.mxu1 %v1975_v15 }
  0x88   :  { %941 = vmatmul.mubr.bf16.gmra.mrb[24].mxu0 %v1972_v18 }
  0x89   :  { %948 = vmatprep.mubr.bf16.mxu0 %v1980_v19 }
  0x8a   :  { %1038 = vmatmul.mubr.bf16.gmra.mrb[24].mxu1 %v1978_v20 }
  0x8b   :  { %1045 = vmatprep.mubr.bf16.mxu1 %v1985_v21 }
  0x90   :  { %949 = vmatmul.mubr.bf16.gmra.mrb[28].mxu0 %v1982_v22 }
  0x91   :  { %1086 = vmatprep.mubr.bf16.mxu0 %v1992_v23 }
  0x92   :  { %1046 = vmatmul.mubr.bf16.gmra.mrb[28].mxu1 %v1988_v24 }
  0x93   :  { %1861 = vmatprep.mubr.bf16.mxu1 %v1994_v25 }
  0x98   :  { %1087 = vmatmul.mubr.bf16.vlgmr.msra.gmra.mrb[32].mxu0 %v1990_v26 }
  0x99   :  { %1094 = vmatprep.mubr.bf16.mxu0 %v1996_v27 }
  0x9a   :  { %1862 = vmatmul.mubr.bf16.vlgmr.msra.gmra.mrb[32].mxu1 %v1995_v28 }
  0x9b   :  { %1865 = vmatprep.mubr.bf16.mxu1 %v2002_v29 }
  0xa0   :  { %1095 = vmatmul.mubr.bf16.gmra.mrb[36].mxu0 %v1998_v30 }
  0xa1   :  { %1102 = vmatprep.mubr.bf16.mxu0 %v1999_v31 }
  0xa2   :  { %1866 = vmatmul.mubr.bf16.gmra.mrb[36].mxu1 %v2003_v32 }
  0xa3   :  { %1869 = vmatprep.mubr.bf16.mxu1 %v2010_v33 }
  0xa8   :  { %1103 = vmatmul.mubr.bf16.gmra.mrb[40].mxu0 %v2001_v34 }
  0xa9   :  { %1110 = vmatprep.mubr.bf16.mxu0 %v2004_v35 }
  0xaa   :  { %1870 = vmatmul.mubr.bf16.gmra.mrb[40].mxu1 %v2011_v36 }
  0xab   :  { %1873 = vmatprep.mubr.bf16.mxu1 %v2018_v37 }
  0xb0   :  { %1111 = vmatmul.mubr.bf16.gmra.mrb[44].mxu0 %v2006_v38 }
  0xb1   :  { %1118 = vmatprep.mubr.bf16.mxu0 %v2007_v39 }
  0xb2   :  { %1874 = vmatmul.mubr.bf16.gmra.mrb[44].mxu1 %v2019_v40 }
  0xb8   :  { %1119 = vmatmul.mubr.bf16.gmra.mrb[48].mxu0 %v2009_v41 }
  0xb9   :  { %1126 = vmatprep.mubr.bf16.mxu0 %v2012_v42 }
  0xc0   :  { %1127 = vmatmul.mubr.bf16.gmra.mrb[52].mxu0 %v2014_v43 }
  0xc1   :  { %1134 = vmatprep.mubr.bf16.mxu0 %v2015_v44 }
  0xc8   :  { %1135 = vmatmul.mubr.bf16.gmra.mrb[56].mxu0 %v2017_v45 }
  0xc9   :  { %1142 = vmatprep.mubr.bf16.mxu0 %v2020_v46 }
  0xd0   :  { %1143 = vmatmul.mubr.bf16.gmra.mrb[60].mxu0 %v2022_v47 }
 0x12b   :  { %v1653_v48 = vpop.f32.mrb[0].mxu0 }
 0x12c   :  { %v1654_v50 = vpop.f32.mrb[1].mxu0 }
 0x12d   :  { %v1655_v51 = vadd.f32 %v1654_v50, %v1653_v48  ;;  %v1656_v52 = vpop.f32.mrb[2].mxu0  ;;  %v1717_v53 = vpop.f32.mrb[0].mxu1 }
 0x12e   :  { %v1657_v54 = vpop.f32.mrb[3].mxu0  ;;  %v1718_v57 = vpop.f32.mrb[1].mxu1 }
 0x12f   :  { %v895_v55 = vadd.f32 %v1655_v51, %v2215_v49  ;;  %v1658_v56 = vadd.f32 %v1657_v54, %v1656_v52  ;;  %v1719_v58 = vadd.f32 %v1718_v57, %v1717_v53  ;;  %v1720_v59 = vpop.f32.mrb[2].mxu1 }
 0x130   :  { %v1721_v61 = vpop.f32.mrb[3].mxu1 }
 0x131   :  { %v898_v60 = vadd.f32 %v1658_v56, %v2215_v49  ;;  %v2219_v62 = vadd.f32 %v1719_v58, %v895_v55  ;;  %v1722_v63 = vadd.f32 %v1721_v61, %v1720_v59 }
 0x133   :  { %v1659_v0 = vpop.f32.mrb[4].mxu0  ;;  %v2221_v1 = vadd.f32 %v1722_v63, %v898_v60 }
 0x134   :  { %v1660_v2 = vpop.f32.mrb[5].mxu0 }
 0x135   :  { %v1661_v3 = vadd.f32 %v1660_v2, %v1659_v0  ;;  %v1662_v4 = vpop.f32.mrb[6].mxu0  ;;  %v1723_v5 = vpop.f32.mrb[4].mxu1 }
 0x136   :  { %v1663_v6 = vpop.f32.mrb[7].mxu0  ;;  %v1724_v9 = vpop.f32.mrb[5].mxu1 }
 0x137   :  { %v903_v7 = vadd.f32 %v1661_v3, %v2215_v49  ;;  %v1664_v8 = vadd.f32 %v1663_v6, %v1662_v4  ;;  %v1725_v10 = vadd.f32 %v1724_v9, %v1723_v5  ;;  %v1726_v11 = vpop.f32.mrb[6].mxu1 }
 0x138   :  { %v1727_v13 = vpop.f32.mrb[7].mxu1 }
 0x139   :  { %v906_v12 = vadd.f32 %v1664_v8, %v2215_v49  ;;  %v2225_v14 = vadd.f32 %v1725_v10, %v903_v7  ;;  %v1728_v15 = vadd.f32 %v1727_v13, %v1726_v11 }
 0x13b   :  { %v1665_v16 = vpop.f32.mrb[8].mxu0  ;;  %v2227_v17 = vadd.f32 %v1728_v15, %v906_v12 }
 0x13c   :  { %v1666_v18 = vpop.f32.mrb[9].mxu0 }
 0x13d   :  { %v1667_v19 = vadd.f32 %v1666_v18, %v1665_v16  ;;  %v1668_v20 = vpop.f32.mrb[10].mxu0  ;;  %v1729_v21 = vpop.f32.mrb[8].mxu1 }
 0x13e   :  { %v1669_v22 = vpop.f32.mrb[11].mxu0  ;;  %v1730_v25 = vpop.f32.mrb[9].mxu1 }
 0x13f   :  { %v911_v23 = vadd.f32 %v1667_v19, %v2215_v49  ;;  %v1670_v24 = vadd.f32 %v1669_v22, %v1668_v20  ;;  %v1731_v26 = vadd.f32 %v1730_v25, %v1729_v21  ;;  %v1732_v27 = vpop.f32.mrb[10].mxu1 }
 0x140   :  { %v1733_v29 = vpop.f32.mrb[11].mxu1 }
 0x141   :  { %v914_v28 = vadd.f32 %v1670_v24, %v2215_v49  ;;  %v2231_v30 = vadd.f32 %v1731_v26, %v911_v23  ;;  %v1734_v31 = vadd.f32 %v1733_v29, %v1732_v27 }
 0x143   :  { %v1671_v32 = vpop.f32.mrb[12].mxu0  ;;  %v2233_v33 = vadd.f32 %v1734_v31, %v914_v28 }
 0x144   :  { %v1672_v34 = vpop.f32.mrb[13].mxu0 }
 0x145   :  { %v1673_v35 = vadd.f32 %v1672_v34, %v1671_v32  ;;  %v1674_v36 = vpop.f32.mrb[14].mxu0  ;;  %v1735_v37 = vpop.f32.mrb[12].mxu1 }
 0x146   :  { %v1675_v38 = vpop.f32.mrb[15].mxu0  ;;  %v1736_v41 = vpop.f32.mrb[13].mxu1 }
 0x147   :  { %v919_v39 = vadd.f32 %v1673_v35, %v2215_v49  ;;  %v1676_v40 = vadd.f32 %v1675_v38, %v1674_v36  ;;  %v1737_v42 = vadd.f32 %v1736_v41, %v1735_v37  ;;  %v1738_v43 = vpop.f32.mrb[14].mxu1 }
 0x148   :  { %v1739_v45 = vpop.f32.mrb[15].mxu1 }
 0x149   :  { %v922_v44 = vadd.f32 %v1676_v40, %v2215_v49  ;;  %v2237_v46 = vadd.f32 %v1737_v42, %v919_v39  ;;  %v1740_v47 = vadd.f32 %v1739_v45, %v1738_v43 }
 0x14b   :  { %v1677_v48 = vpop.f32.mrb[16].mxu0  ;;  %v2239_v50 = vadd.f32 %v1740_v47, %v922_v44 }
 0x14c   :  { %v1678_v51 = vpop.f32.mrb[17].mxu0 }
 0x14d   :  { %v1679_v52 = vadd.f32 %v1678_v51, %v1677_v48  ;;  %v1680_v53 = vpop.f32.mrb[18].mxu0  ;;  %v1741_v54 = vpop.f32.mrb[16].mxu1 }
 0x14e   :  { %v1681_v55 = vpop.f32.mrb[19].mxu0  ;;  %v1742_v58 = vpop.f32.mrb[17].mxu1 }
 0x14f   :  { %v927_v56 = vadd.f32 %v1679_v52, %v2215_v49  ;;  %v1682_v57 = vadd.f32 %v1681_v55, %v1680_v53  ;;  %v1743_v59 = vadd.f32 %v1742_v58, %v1741_v54  ;;  %v1744_v60 = vpop.f32.mrb[18].mxu1 }
 0x150   :  { %v1745_v63 = vpop.f32.mrb[19].mxu1 }
 0x151   :  { %v930_v61 = vadd.f32 %v1682_v57, %v2215_v49  ;;  %v2243_v0 = vadd.f32 %v1743_v59, %v927_v56  ;;  %v1746_v2 = vadd.f32 %v1745_v63, %v1744_v60 }
 0x153   :  { %v1683_v3 = vpop.f32.mrb[20].mxu0  ;;  %v2245_v4 = vadd.f32 %v1746_v2, %v930_v61 }
 0x154   :  { %v1684_v5 = vpop.f32.mrb[21].mxu0 }
 0x155   :  { %v1685_v6 = vadd.f32 %v1684_v5, %v1683_v3  ;;  %v1686_v7 = vpop.f32.mrb[22].mxu0  ;;  %v1747_v8 = vpop.f32.mrb[20].mxu1 }
 0x156   :  { %v1687_v9 = vpop.f32.mrb[23].mxu0  ;;  %v1748_v12 = vpop.f32.mrb[21].mxu1 }
 0x157   :  { %v935_v10 = vadd.f32 %v1685_v6, %v2215_v49  ;;  %v1688_v11 = vadd.f32 %v1687_v9, %v1686_v7  ;;  %v1749_v13 = vadd.f32 %v1748_v12, %v1747_v8  ;;  %v1750_v15 = vpop.f32.mrb[22].mxu1 }
 0x158   :  { %v1751_v18 = vpop.f32.mrb[23].mxu1 }
 0x159   :  { %v938_v16 = vadd.f32 %v1688_v11, %v2215_v49  ;;  %v2249_v19 = vadd.f32 %v1749_v13, %v935_v10  ;;  %v1752_v20 = vadd.f32 %v1751_v18, %v1750_v15 }
 0x15b   :  { %v1689_v21 = vpop.f32.mrb[24].mxu0  ;;  %v2251_v22 = vadd.f32 %v1752_v20, %v938_v16 }
 0x15c   :  { %v1690_v23 = vpop.f32.mrb[25].mxu0 }
 0x15d   :  { %v1691_v24 = vadd.f32 %v1690_v23, %v1689_v21  ;;  %v1692_v25 = vpop.f32.mrb[26].mxu0  ;;  %v1753_v26 = vpop.f32.mrb[24].mxu1 }
 0x15e   :  { %v1693_v27 = vpop.f32.mrb[27].mxu0  ;;  %v1754_v31 = vpop.f32.mrb[25].mxu1 }
 0x15f   :  { %v943_v28 = vadd.f32 %v1691_v24, %v2215_v49  ;;  %v1694_v29 = vadd.f32 %v1693_v27, %v1692_v25  ;;  %v1755_v32 = vadd.f32 %v1754_v31, %v1753_v26  ;;  %v1756_v34 = vpop.f32.mrb[26].mxu1 }
 0x160   :  { %v1757_v36 = vpop.f32.mrb[27].mxu1 }
 0x161   :  { %v946_v35 = vadd.f32 %v1694_v29, %v2215_v49  ;;  %v2255_v37 = vadd.f32 %v1755_v32, %v943_v28  ;;  %v1758_v38 = vadd.f32 %v1757_v36, %v1756_v34 }
 0x163   :  { %v1695_v39 = vpop.f32.mrb[28].mxu0  ;;  %v2257_v40 = vadd.f32 %v1758_v38, %v946_v35 }
 0x164   :  { %v1696_v41 = vpop.f32.mrb[29].mxu0 }
 0x165   :  { %v1697_v42 = vadd.f32 %v1696_v41, %v1695_v39  ;;  %v1698_v43 = vpop.f32.mrb[30].mxu0  ;;  %v1759_v44 = vpop.f32.mrb[28].mxu1 }
 0x166   :  { %v1699_v45 = vpop.f32.mrb[31].mxu0  ;;  %v1760_v51 = vpop.f32.mrb[29].mxu1 }
 0x167   :  { %v951_v47 = vadd.f32 %v1697_v42, %v2215_v49  ;;  %v1700_v48 = vadd.f32 %v1699_v45, %v1698_v43  ;;  %v1761_v52 = vadd.f32 %v1760_v51, %v1759_v44  ;;  %v1762_v53 = vpop.f32.mrb[30].mxu1 }
 0x168   :  { %v1763_v55 = vpop.f32.mrb[31].mxu1 }
 0x169   :  { %v954_v54 = vadd.f32 %v1700_v48, %v2215_v49  ;;  %v2261_v56 = vadd.f32 %v1761_v52, %v951_v47  ;;  %v1764_v57 = vadd.f32 %v1763_v55, %v1762_v53 }
 0x16b   :  { %v1781_v58 = vpop.f32.mrb[32].mxu0  ;;  %v2263_v59 = vadd.f32 %v1764_v57, %v954_v54 }
 0x16c   :  { %v1782_v60 = vpop.f32.mrb[33].mxu0 }
 0x16d   :  { %v1783_v61 = vadd.f32 %v1782_v60, %v1781_v58  ;;  %v1784_v63 = vpop.f32.mrb[34].mxu0  ;;  %v1863_v3 = vpop.f32.mrb[32].mxu1 }
 0x16e   :  { %v1785_v2 = vpop.f32.mrb[35].mxu0  ;;  %v1185_v7 = vpop.f32.mrb[33].mxu1 }
 0x16f   :  { %v1786_v5 = vadd.f32 %v1785_v2, %v1784_v63  ;;  %v1089_v6 = vadd.f32 %v1783_v61, %v2219_v62  ;;  %v1864_v8 = vpop.f32.mrb[34].mxu1 }
 0x170   :  { %v1188_v10 = vpop.f32.mrb[35].mxu1 }
 0x171   :  { %v2266_v9 = vadd.f32 %v1185_v7, %v1089_v6  ;;  %v1092_v49 = vadd.f32 %v1786_v5, %v2221_v1 }
 0x173   :  { %v2269_v11 = vadd.f32 %v1188_v10, %v1092_v49  ;;  %v1787_v12 = vpop.f32.mrb[36].mxu0  ;;  %1251 = vadd.xlane.f32.xlu0 %v2266_v9 }
 0x174   :  { %v1788_v13 = vpop.f32.mrb[37].mxu0 }
 0x175   :  { %v1789_v15 = vadd.f32 %v1788_v13, %v1787_v12  ;;  %v1790_v16 = vpop.f32.mrb[38].mxu0  ;;  %v1867_v20 = vpop.f32.mrb[36].mxu1 }
 0x176   :  { %v1791_v18 = vpop.f32.mrb[39].mxu0  ;;  %v1201_v23 = vpop.f32.mrb[37].mxu1 }
 0x177   :  { %v1097_v21 = vadd.f32 %v1789_v15, %v2225_v14  ;;  %v1792_v62 = vadd.f32 %v1791_v18, %v1790_v16  ;;  %1253 = vadd.xlane.f32.xlu0 %v2269_v11  ;;  %v1868_v24 = vpop.f32.mrb[38].mxu1 }
 0x178   :  { %v1204_v26 = vpop.f32.mrb[39].mxu1 }
 0x179   :  { %v1100_v1 = vadd.f32 %v1792_v62, %v2227_v17  ;;  %v2275_v25 = vadd.f32 %v1863_v3, %v1097_v21 }
 0x17b   :  { %v1793_v27 = vpop.f32.mrb[40].mxu0  ;;  %1255 = vadd.xlane.f32.xlu1 %v2275_v25  ;;  %v2278_v28 = vadd.f32 %v1864_v8, %v1100_v1 }
 0x17c   :  { %v1794_v29 = vpop.f32.mrb[41].mxu0 }
 0x17d   :  { %v1795_v31 = vadd.f32 %v1794_v29, %v1793_v27  ;;  %v1796_v32 = vpop.f32.mrb[42].mxu0  ;;  %v1871_v14 = vpop.f32.mrb[40].mxu1 }
 0x17e   :  { %v1797_v34 = vpop.f32.mrb[43].mxu0  ;;  %v1217_v38 = vpop.f32.mrb[41].mxu1 }
 0x17f   :  { %v1798_v35 = vadd.f32 %v1797_v34, %v1796_v32  ;;  %1257 = vadd.xlane.f32.xlu1 %v2278_v28  ;;  %v1105_v36 = vadd.f32 %v1795_v31, %v2231_v30  ;;  %v1872_v17 = vpop.f32.mrb[42].mxu1 }
 0x180   :  { %v1220_v42 = vpop.f32.mrb[43].mxu1 }
 0x181   :  { %v2282_v39 = vadd.f32 %v1201_v23, %v1105_v36  ;;  %v1108_v41 = vadd.f32 %v1798_v35, %v2233_v33 }
 0x183   :  { %v2285_v43 = vadd.f32 %v1204_v26, %v1108_v41  ;;  %v1799_v44 = vpop.f32.mrb[44].mxu0  ;;  %1259 = vadd.xlane.f32.xlu0 %v2282_v39 }
 0x184   :  { %v1800_v45 = vpop.f32.mrb[45].mxu0 }
 0x185   :  { %v1801_v47 = vadd.f32 %v1800_v45, %v1799_v44  ;;  %v1802_v48 = vpop.f32.mrb[46].mxu0  ;;  %1261 = vadd.xlane.f32.xlu1 %v2285_v43  ;;  %v1875_v52 = vpop.f32.mrb[44].mxu1  ;;  %v2329_v44 = vld [vmem:[#allocation7 + $0x3] ss:$0 sm:$0xff] }
 0x186   :  { %v1803_v51 = vpop.f32.mrb[47].mxu0  ;;  %v1233_v54 = vpop.f32.mrb[45].mxu1 }
 0x187   :  { %v1113_v30 = vadd.f32 %v1801_v47, %v2237_v46  ;;  %v1804_v53 = vadd.f32 %v1803_v51, %v1802_v48  ;;  %v1876_v55 = vpop.f32.mrb[46].mxu1 }
 0x188   :  { %v1236_v58 = vpop.f32.mrb[47].mxu1 }
 0x189   :  { %v1116_v33 = vadd.f32 %v1804_v53, %v2239_v50  ;;  %v2291_v57 = vadd.f32 %v1867_v20, %v1113_v30 }
 0x18b   :  { %v1805_v60 = vpop.f32.mrb[48].mxu0  ;;  %1263 = vadd.xlane.f32.xlu0 %v2291_v57  ;;  %v2294_v61 = vadd.f32 %v1868_v24, %v1116_v33 }
 0x18c   :  { %v1806_v63 = vpop.f32.mrb[49].mxu0 }
 0x18d   :  { %v1807_v2 = vadd.f32 %v1806_v63, %v1805_v60  ;;  %v1808_v3 = vpop.f32.mrb[50].mxu0  ;;  %1265 = vadd.xlane.f32.xlu1 %v2294_v61 }
 0x18e   :  { %v1809_v5 = vpop.f32.mrb[51].mxu0 }
 0x18f   :  { %v1810_v46 = vadd.f32 %v1809_v5, %v1808_v3  ;;  %v1121_v6 = vadd.f32 %v1807_v2, %v2243_v0 }
 0x191   :  { %v2298_v7 = vadd.f32 %v1217_v38, %v1121_v6  ;;  %v1124_v50 = vadd.f32 %v1810_v46, %v2245_v4 }
 0x193   :  { %v2301_v8 = vadd.f32 %v1220_v42, %v1124_v50  ;;  %v1811_v49 = vpop.f32.mrb[52].mxu0  ;;  %1267 = vadd.xlane.f32.xlu0 %v2298_v7 }
 0x194   :  { %v1812_v10 = vpop.f32.mrb[53].mxu0 }
 0x195   :  { %v1813_v12 = vadd.f32 %v1812_v10, %v1811_v49  ;;  %v1814_v13 = vpop.f32.mrb[54].mxu0  ;;  %1269 = vadd.xlane.f32.xlu1 %v2301_v8 }
 0x196   :  { %v1815_v15 = vpop.f32.mrb[55].mxu0 }
 0x197   :  { %v1129_v16 = vadd.f32 %v1813_v12, %v2249_v19  ;;  %v1816_v18 = vadd.f32 %v1815_v15, %v1814_v13 }
 0x199   :  { %v1132_v0 = vadd.f32 %v1816_v18, %v2251_v22  ;;  %v2307_v20 = vadd.f32 %v1871_v14, %v1129_v16 }
 0x19b   :  { %v1817_v21 = vpop.f32.mrb[56].mxu0  ;;  %1271 = vadd.xlane.f32.xlu0 %v2307_v20  ;;  %v2310_v4 = vadd.f32 %v1872_v17, %v1132_v0 }
 0x19c   :  { %v1818_v62 = vpop.f32.mrb[57].mxu0 }
 0x19d   :  { %v1819_v23 = vadd.f32 %v1818_v62, %v1817_v21  ;;  %v1820_v24 = vpop.f32.mrb[58].mxu0  ;;  %1273 = vadd.xlane.f32.xlu1 %v2310_v4 }
 0x19e   :  { %v1821_v1 = vpop.f32.mrb[59].mxu0 }
 0x19f   :  { %v1822_v26 = vadd.f32 %v1821_v1, %v1820_v24  ;;  %v1137_v27 = vadd.f32 %v1819_v23, %v2255_v37 }
 0x1a1   :  { %v2314_v19 = vadd.f32 %v1233_v54, %v1137_v27  ;;  %v1140_v22 = vadd.f32 %v1822_v26, %v2257_v40 }
 0x1a3   :  { %v2317_v29 = vadd.f32 %v1236_v58, %v1140_v22  ;;  %v1823_v31 = vpop.f32.mrb[60].mxu0  ;;  %1275 = vadd.xlane.f32.xlu0 %v2314_v19 }
 0x1a4   :  { %v1824_v32 = vpop.f32.mrb[61].mxu0 }
 0x1a5   :  { %v1825_v34 = vadd.f32 %v1824_v32, %v1823_v31  ;;  %v1826_v14 = vpop.f32.mrb[62].mxu0  ;;  %1277 = vadd.xlane.f32.xlu1 %v2317_v29 }
 0x1a6   :  { %v1827_v35 = vpop.f32.mrb[63].mxu0 }
 0x1a7   :  { %v1145_v36 = vadd.f32 %v1825_v34, %v2261_v56  ;;  %v1828_v38 = vadd.f32 %v1827_v35, %v1826_v14 }
 0x1a9   :  { %v1148_v37 = vadd.f32 %v1828_v38, %v2263_v59  ;;  %v2323_v17 = vadd.f32 %v1875_v52, %v1145_v36 }
 0x1ab   :  { %1279 = vadd.xlane.f32.xlu0 %v2323_v17  ;;  %v2326_v40 = vadd.f32 %v1876_v55, %v1148_v37 }
 0x1ad   :  { %1281 = vadd.xlane.f32.xlu1 %v2326_v40 }
 0x200   :  { %v1252_v41 = vpop.xlane.xlu0 %1251 }
 0x201   :  { %v1283_v42 = vmul.f32 0.015625, %v1252_v41 }
 0x203   :  { %v2332_v45 = vsub.f32 %v2266_v9, %v1283_v42 }
 0x204   :  { %v1254_v47 = vpop.xlane.xlu0 %1253 }
 0x205   :  { %v1284_v56 = vmul.f32 0.015625, %v1254_v47  ;;  %v1319_v59 = vmul.f32 %v2329_v44, %v2332_v45 }
 0x207   :  { %v2337_v48 = vsub.f32 %v2269_v11, %v1284_v56  ;;  %v1335_v51 = vmul.f32 %v1319_v59, %v1319_v59 }
 0x208   :  { %v1256_v52 = vpop.xlane.xlu1 %1255 }
 0x209   :  { %v1285_v30 = vmul.f32 0.015625, %v1256_v52  ;;  %1351 = vadd.xlane.f32.xlu0 %v1335_v51  ;;  %v1320_v53 = vmul.f32 %v2329_v44, %v2337_v48 }
 0x20b   :  { %v2342_v54 = vsub.f32 %v2275_v25, %v1285_v30  ;;  %v1336_v9 = vmul.f32 %v1320_v53, %v1320_v53 }
 0x20c   :  { %v1258_v55 = vpop.xlane.xlu1 %1257 }
 0x20d   :  { %v1286_v33 = vmul.f32 0.015625, %v1258_v55  ;;  %1353 = vadd.xlane.f32.xlu1 %v1336_v9  ;;  %v1321_v58 = vmul.f32 %v2329_v44, %v2342_v54 }
 0x20f   :  { %v2347_v11 = vsub.f32 %v2278_v28, %v1286_v33  ;;  %v1337_v60 = vmul.f32 %v1321_v58, %v1321_v58 }
 0x210   :  { %v1260_v63 = vpop.xlane.xlu0 %1259 }
 0x211   :  { %v1287_v2 = vmul.f32 0.015625, %v1260_v63  ;;  %1355 = vadd.xlane.f32.xlu0 %v1337_v60  ;;  %v1322_v3 = vmul.f32 %v2329_v44, %v2347_v11 }
 0x212   :  { %v1262_v5 = vpop.xlane.xlu1 %1261 }
 0x213   :  { %v2352_v25 = vsub.f32 %v2282_v39, %v1287_v2  ;;  %v1288_v46 = vmul.f32 0.015625, %v1262_v5  ;;  %v1338_v6 = vmul.f32 %v1322_v3, %v1322_v3 }
 0x215   :  { %v2355_v50 = vsub.f32 %v2285_v43, %v1288_v46  ;;  %1357 = vadd.xlane.f32.xlu1 %v1338_v6  ;;  %v1323_v28 = vmul.f32 %v2329_v44, %v2352_v25 }
 0x217   :  { %v1339_v49 = vmul.f32 %v1323_v28, %v1323_v28  ;;  %v1324_v10 = vmul.f32 %v2329_v44, %v2355_v50 }
 0x218   :  { %v1264_v12 = vpop.xlane.xlu0 %1263 }
 0x219   :  { %v1289_v13 = vmul.f32 0.015625, %v1264_v12  ;;  %1359 = vadd.xlane.f32.xlu0 %v1339_v49  ;;  %v1340_v15 = vmul.f32 %v1324_v10, %v1324_v10 }
 0x21a   :  { %v1266_v16 = vpop.xlane.xlu1 %1265 }
 0x21b   :  { %v2362_v39 = vsub.f32 %v2291_v57, %v1289_v13  ;;  %v1290_v18 = vmul.f32 0.015625, %v1266_v16  ;;  %1361 = vadd.xlane.f32.xlu1 %v1340_v15 }
 0x21d   :  { %v2365_v43 = vsub.f32 %v2294_v61, %v1290_v18  ;;  %v1325_v0 = vmul.f32 %v2329_v44, %v2362_v39  ;;  %v2411_v18 = vld [vmem:[#allocation7 + $0x1] ss:$0 sm:$0xff] }
 0x21f   :  { %v1341_v21 = vmul.f32 %v1325_v0, %v1325_v0  ;;  %v1326_v62 = vmul.f32 %v2329_v44, %v2365_v43 }
 0x220   :  { %v1268_v23 = vpop.xlane.xlu0 %1267 }
 0x221   :  { %v1291_v24 = vmul.f32 0.015625, %v1268_v23  ;;  %1363 = vadd.xlane.f32.xlu0 %v1341_v21  ;;  %v1342_v1 = vmul.f32 %v1326_v62, %v1326_v62 }
 0x222   :  { %v1270_v26 = vpop.xlane.xlu1 %1269 }
 0x223   :  { %v2372_v57 = vsub.f32 %v2298_v7, %v1291_v24  ;;  %v1292_v27 = vmul.f32 0.015625, %v1270_v26  ;;  %1365 = vadd.xlane.f32.xlu1 %v1342_v1  ;;  %v2414_v24 = vld [vmem:[#allocation7 + $0x2] ss:$0 sm:$0xff] }
 0x225   :  { %v2375_v61 = vsub.f32 %v2301_v8, %v1292_v27  ;;  %v1327_v22 = vmul.f32 %v2329_v44, %v2372_v57 }
 0x227   :  { %v1343_v31 = vmul.f32 %v1327_v22, %v1327_v22  ;;  %v1328_v32 = vmul.f32 %v2329_v44, %v2375_v61 }
 0x228   :  { %v1272_v34 = vpop.xlane.xlu0 %1271 }
 0x229   :  { %v1293_v14 = vmul.f32 0.015625, %v1272_v34  ;;  %1367 = vadd.xlane.f32.xlu0 %v1343_v31  ;;  %v1344_v35 = vmul.f32 %v1328_v32, %v1328_v32 }
 0x22a   :  { %v1274_v36 = vpop.xlane.xlu1 %1273 }
 0x22b   :  { %v2382_v7 = vsub.f32 %v2307_v20, %v1293_v14  ;;  %v1294_v38 = vmul.f32 0.015625, %v1274_v36  ;;  %1369 = vadd.xlane.f32.xlu1 %v1344_v35 }
 0x22d   :  { %v2385_v8 = vsub.f32 %v2310_v4, %v1294_v38  ;;  %v1329_v37 = vmul.f32 %v2329_v44, %v2382_v7 }
 0x22f   :  { %v1345_v41 = vmul.f32 %v1329_v37, %v1329_v37  ;;  %v1330_v42 = vmul.f32 %v2329_v44, %v2385_v8 }
 0x230   :  { %v1276_v47 = vpop.xlane.xlu0 %1275 }
 0x231   :  { %v1295_v56 = vmul.f32 0.015625, %v1276_v47  ;;  %1371 = vadd.xlane.f32.xlu0 %v1345_v41  ;;  %v1346_v59 = vmul.f32 %v1330_v42, %v1330_v42 }
 0x232   :  { %v1278_v51 = vpop.xlane.xlu1 %1277 }
 0x233   :  { %v2392_v20 = vsub.f32 %v2314_v19, %v1295_v56  ;;  %v1296_v52 = vmul.f32 0.015625, %v1278_v51  ;;  %1373 = vadd.xlane.f32.xlu1 %v1346_v59 }
 0x235   :  { %v2395_v4 = vsub.f32 %v2317_v29, %v1296_v52  ;;  %v1331_v30 = vmul.f32 %v2329_v44, %v2392_v20 }
 0x237   :  { %v1347_v53 = vmul.f32 %v1331_v30, %v1331_v30  ;;  %v1332_v9 = vmul.f32 %v2329_v44, %v2395_v4 }
 0x238   :  { %v1280_v55 = vpop.xlane.xlu0 %1279 }
 0x239   :  { %v1297_v33 = vmul.f32 0.015625, %v1280_v55  ;;  %1375 = vadd.xlane.f32.xlu0 %v1347_v53  ;;  %v1348_v58 = vmul.f32 %v1332_v9, %v1332_v9 }
 0x23a   :  { %v1282_v60 = vpop.xlane.xlu1 %1281 }
 0x23b   :  { %v2402_v19 = vsub.f32 %v2323_v17, %v1297_v33  ;;  %v1298_v63 = vmul.f32 0.015625, %v1282_v60  ;;  %1377 = vadd.xlane.f32.xlu1 %v1348_v58 }
 0x23d   :  { %v2405_v29 = vsub.f32 %v2326_v40, %v1298_v63  ;;  %v1333_v2 = vmul.f32 %v2329_v44, %v2402_v19 }
 0x23f   :  { %v1349_v3 = vmul.f32 %v1333_v2, %v1333_v2  ;;  %v1334_v5 = vmul.f32 %v2329_v44, %v2405_v29 }
 0x241   :  { %1379 = vadd.xlane.f32.xlu0 %v1349_v3  ;;  %v1350_v46 = vmul.f32 %v1334_v5, %v1334_v5 }
 0x243   :  { %1381 = vadd.xlane.f32.xlu1 %v1350_v46 }
 0x296   :  { %v1352_v6 = vpop.xlane.xlu0 %1351 }
 0x297   :  { %v1383_v28 = vmul.f32 0.015625, %v1352_v6 }
 0x299   :  { %v1399_v49 = vadd.f32 1e-05, %v1383_v28 }
 0x29a   :  { %v1354_v17 = vpop.xlane.xlu1 %1353 }
 0x29b   :  { %2023 = vrsqrt.f32 %v1399_v49  ;;  %v1384_v10 = vmul.f32 0.015625, %v1354_v17 }
 0x29d   :  { %v1400_v12 = vadd.f32 1e-05, %v1384_v10 }
 0x29e   :  { %v1356_v13 = vpop.xlane.xlu0 %1355 }
 0x29f   :  { %2025 = vrsqrt.f32 %v1400_v12  ;;  %v1385_v40 = vmul.f32 0.015625, %v1356_v13 }
 0x2a1   :  { %v1401_v15 = vadd.f32 1e-05, %v1385_v40 }
 0x2a2   :  { %v1358_v16 = vpop.xlane.xlu1 %1357 }
 0x2a3   :  { %2027 = vrsqrt.f32 %v1401_v15  ;;  %v1386_v0 = vmul.f32 0.015625, %v1358_v16 }
 0x2a5   :  { %v2024_v44 = vpop.eup %2023  ;;  %v1402_v21 = vadd.f32 1e-05, %v1386_v0 }
 0x2a6   :  { %v1435_v62 = vmul.f32 %v2024_v44, %v2411_v18  ;;  %v1360_v23 = vpop.xlane.xlu0 %1359 }
 0x2a7   :  { %2029 = vrsqrt.f32 %v1402_v21  ;;  %v1387_v1 = vmul.f32 0.015625, %v1360_v23 }
 0x2a8   :  { %v1451_v26 = vmul.f32 %v1435_v62, %v2332_v45  ;;  %v1362_v27 = vpop.xlane.xlu1 %1361 }
 0x2a9   :  { %v2026_v22 = vpop.eup %2025  ;;  %v1403_v31 = vadd.f32 1e-05, %v1387_v1  ;;  %v1388_v32 = vmul.f32 0.015625, %v1362_v27 }
 0x2aa   :  { %v1471_v34 = vadd.f32 %v2414_v24, %v1451_v26  ;;  %v1436_v14 = vmul.f32 %v2026_v22, %v2411_v18 }
 0x2ab   :  { %2031 = vrsqrt.f32 %v1403_v31  ;;  %v1404_v35 = vadd.f32 1e-05, %v1388_v32 }
 0x2ac   :  { %1487 = vst [vmem:[#allocation8] sm:$0xff] %v1471_v34  ;;  %v1452_v36 = vmul.f32 %v1436_v14, %v2337_v48 }
 0x2ad   :  { %v2028_v38 = vpop.eup %2027  ;;  %2033 = vrsqrt.f32 %v1404_v35 }
 0x2ae   :  { %v1472_v37 = vadd.f32 %v2414_v24, %v1452_v36  ;;  %v1437_v41 = vmul.f32 %v2028_v38, %v2411_v18  ;;  %v1364_v45 = vpop.xlane.xlu0 %1363 }
 0x2af   :  { %v1389_v42 = vmul.f32 0.015625, %v1364_v45 }
 0x2b0   :  { %1488 = vst [vmem:[#allocation8 + $0x8] sm:$0xff] %v1472_v37  ;;  %v1453_v47 = vmul.f32 %v1437_v41, %v2342_v54  ;;  %v1366_v56 = vpop.xlane.xlu1 %1365 }
 0x2b1   :  { %v2030_v59 = vpop.eup %2029  ;;  %v1405_v51 = vadd.f32 1e-05, %v1389_v42  ;;  %v1390_v52 = vmul.f32 0.015625, %v1366_v56 }
 0x2b2   :  { %v1473_v30 = vadd.f32 %v2414_v24, %v1453_v47  ;;  %v1438_v53 = vmul.f32 %v2030_v59, %v2411_v18 }
 0x2b3   :  { %2035 = vrsqrt.f32 %v1405_v51  ;;  %v1406_v48 = vadd.f32 1e-05, %v1390_v52 }
 0x2b4   :  { %1489 = vst [vmem:[#allocation8 + $0x10] sm:$0xff] %v1473_v30  ;;  %v1454_v9 = vmul.f32 %v1438_v53, %v2347_v11 }
 0x2b5   :  { %v2032_v55 = vpop.eup %2031  ;;  %2037 = vrsqrt.f32 %v1406_v48 }
 0x2b6   :  { %v1474_v33 = vadd.f32 %v2414_v24, %v1454_v9  ;;  %v1439_v58 = vmul.f32 %v2032_v55, %v2411_v18  ;;  %v1368_v54 = vpop.xlane.xlu0 %1367 }
 0x2b7   :  { %v2034_v60 = vpop.eup %2033  ;;  %v1391_v63 = vmul.f32 0.015625, %v1368_v54 }
 0x2b8   :  { %1490 = vst [vmem:[#allocation8 + $0x18] sm:$0xff] %v1474_v33  ;;  %v1455_v2 = vmul.f32 %v1439_v58, %v2352_v25  ;;  %v1440_v3 = vmul.f32 %v2034_v60, %v2411_v18  ;;  %v1370_v5 = vpop.xlane.xlu1 %1369 }
 0x2b9   :  { %v1407_v46 = vadd.f32 1e-05, %v1391_v63  ;;  %v1392_v6 = vmul.f32 0.015625, %v1370_v5 }
 0x2ba   :  { %v1475_v28 = vadd.f32 %v2414_v24, %v1455_v2  ;;  %v1456_v11 = vmul.f32 %v1440_v3, %v2355_v50 }
 0x2bb   :  { %2039 = vrsqrt.f32 %v1407_v46  ;;  %v1408_v49 = vadd.f32 1e-05, %v1392_v6 }
 0x2bc   :  { %1491 = vst [vmem:[#allocation8 + $0x20] sm:$0xff] %v1475_v28  ;;  %v1476_v17 = vadd.f32 %v2414_v24, %v1456_v11 }
 0x2bd   :  { %v2036_v10 = vpop.eup %2035  ;;  %2041 = vrsqrt.f32 %v1408_v49 }
 0x2be   :  { %1492 = vst [vmem:[#allocation8 + $0x28] sm:$0xff] %v1476_v17  ;;  %v1441_v12 = vmul.f32 %v2036_v10, %v2411_v18  ;;  %v1372_v25 = vpop.xlane.xlu0 %1371 }
 0x2bf   :  { %v2038_v13 = vpop.eup %2037  ;;  %v1393_v40 = vmul.f32 0.015625, %v1372_v25 }
 0x2c0   :  { %v1457_v15 = vmul.f32 %v1441_v12, %v2362_v39  ;;  %v1442_v16 = vmul.f32 %v2038_v13, %v2411_v18  ;;  %v1374_v0 = vpop.xlane.xlu1 %1373 }
 0x2c1   :  { %v1409_v44 = vadd.f32 1e-05, %v1393_v40  ;;  %v1394_v50 = vmul.f32 0.015625, %v1374_v0 }
 0x2c2   :  { %v1477_v21 = vadd.f32 %v2414_v24, %v1457_v15  ;;  %v1458_v62 = vmul.f32 %v1442_v16, %v2365_v43 }
 0x2c3   :  { %2043 = vrsqrt.f32 %v1409_v44  ;;  %v1410_v23 = vadd.f32 1e-05, %v1394_v50 }
 0x2c4   :  { %1493 = vst [vmem:[#allocation8 + $0x30] sm:$0xff] %v1477_v21  ;;  %v1478_v1 = vadd.f32 %v2414_v24, %v1458_v62 }
 0x2c5   :  { %v2040_v26 = vpop.eup %2039  ;;  %2045 = vrsqrt.f32 %v1410_v23 }
 0x2c6   :  { %1494 = vst [vmem:[#allocation8 + $0x38] sm:$0xff] %v1478_v1  ;;  %v1443_v27 = vmul.f32 %v2040_v26, %v2411_v18  ;;  %v1376_v39 = vpop.xlane.xlu0 %1375 }
 0x2c7   :  { %v2042_v22 = vpop.eup %2041  ;;  %v1395_v31 = vmul.f32 0.015625, %v1376_v39 }
 0x2c8   :  { %v1459_v32 = vmul.f32 %v1443_v27, %v2372_v57  ;;  %v1444_v34 = vmul.f32 %v2042_v22, %v2411_v18  ;;  %v1378_v14 = vpop.xlane.xlu1 %1377 }
 0x2c9   :  { %v1411_v35 = vadd.f32 1e-05, %v1395_v31  ;;  %v1396_v43 = vmul.f32 0.015625, %v1378_v14 }
 0x2ca   :  { %v1479_v36 = vadd.f32 %v2414_v24, %v1459_v32  ;;  %v1460_v38 = vmul.f32 %v1444_v34, %v2375_v61 }
 0x2cb   :  { %2047 = vrsqrt.f32 %v1411_v35  ;;  %v1412_v37 = vadd.f32 1e-05, %v1396_v43 }
 0x2cc   :  { %1495 = vst [vmem:[#allocation8 + $0x40] sm:$0xff] %v1479_v36  ;;  %v1480_v41 = vadd.f32 %v2414_v24, %v1460_v38 }
 0x2cd   :  { %v2044_v45 = vpop.eup %2043  ;;  %2049 = vrsqrt.f32 %v1412_v37 }
 0x2ce   :  { %1496 = vst [vmem:[#allocation8 + $0x48] sm:$0xff] %v1480_v41  ;;  %v1445_v42 = vmul.f32 %v2044_v45, %v2411_v18  ;;  %v1380_v57 = vpop.xlane.xlu0 %1379 }
 0x2cf   :  { %v2046_v47 = vpop.eup %2045  ;;  %v1397_v56 = vmul.f32 0.015625, %v1380_v57 }
 0x2d0   :  { %v1461_v59 = vmul.f32 %v1445_v42, %v2382_v7  ;;  %v1446_v51 = vmul.f32 %v2046_v47, %v2411_v18  ;;  %v1382_v52 = vpop.xlane.xlu1 %1381 }
 0x2d1   :  { %v1413_v30 = vadd.f32 1e-05, %v1397_v56  ;;  %v1398_v61 = vmul.f32 0.015625, %v1382_v52 }
 0x2d2   :  { %v1481_v53 = vadd.f32 %v2414_v24, %v1461_v59  ;;  %v1462_v48 = vmul.f32 %v1446_v51, %v2385_v8 }
 0x2d3   :  { %2051 = vrsqrt.f32 %v1413_v30  ;;  %v1414_v9 = vadd.f32 1e-05, %v1398_v61 }
 0x2d4   :  { %1497 = vst [vmem:[#allocation8 + $0x50] sm:$0xff] %v1481_v53  ;;  %v1482_v55 = vadd.f32 %v2414_v24, %v1462_v48 }
 0x2d5   :  { %v2048_v33 = vpop.eup %2047  ;;  %2053 = vrsqrt.f32 %v1414_v9 }
 0x2d6   :  { %1498 = vst [vmem:[#allocation8 + $0x58] sm:$0xff] %v1482_v55  ;;  %v1447_v58 = vmul.f32 %v2048_v33, %v2411_v18 }
 0x2d7   :  { %v2050_v7 = vpop.eup %2049 }
 0x2d8   :  { %v1463_v54 = vmul.f32 %v1447_v58, %v2392_v20  ;;  %v1448_v60 = vmul.f32 %v2050_v7, %v2411_v18 }
 0x2da   :  { %v1483_v63 = vadd.f32 %v2414_v24, %v1463_v54  ;;  %v1464_v2 = vmul.f32 %v1448_v60, %v2395_v4 }
 0x2dc   :  { %1499 = vst [vmem:[#allocation8 + $0x60] sm:$0xff] %v1483_v63  ;;  %v1484_v8 = vadd.f32 %v2414_v24, %v1464_v2 }
 0x2dd   :  { %v2052_v3 = vpop.eup %2051 }
 0x2de   :  { %1500 = vst [vmem:[#allocation8 + $0x68] sm:$0xff] %v1484_v8  ;;  %v1449_v5 = vmul.f32 %v2052_v3, %v2411_v18 }
 0x2df   :  { %v2054_v46 = vpop.eup %2053 }
 0x2e0   :  { %v1465_v6 = vmul.f32 %v1449_v5, %v2402_v19  ;;  %v1450_v28 = vmul.f32 %v2054_v46, %v2411_v18 }
 0x2e2   :  { %v1485_v20 = vadd.f32 %v2414_v24, %v1465_v6  ;;  %v1466_v11 = vmul.f32 %v1450_v28, %v2405_v29 }
 0x2e4   :  { %1501 = vst [vmem:[#allocation8 + $0x70] sm:$0xff] %v1485_v20  ;;  %v1486_v4 = vadd.f32 %v2414_v24, %v1466_v11 }
 0x2e6   :  { %1502 = vst [vmem:[#allocation8 + $0x78] sm:$0xff] %v1486_v4 }
 0x2e7   :  { %2132 = shalt.err (!%p2129_p0)
}
 0x2e8   :  { %s2133_s27 = scalar_lea.hbm %s2478_s3, 2048 }
 0x2e9   :  { %p2134_p1 = scmp.ne.s32.totalorder %s2478_s3, %s2133_s27  ;;  %p2137_p2 = scmp.lt.u32.totalorder %s2133_s27, %s2478_s3 }
 0x2eb   :  { %p2139_p3 = pnand %p2137_p2, %p2134_p1 }
 0x2ed   :  { %2142 = shalt.err (!%p2139_p3)
}
 0x2ee   :  { %s2157_s5 = smov 128   ;;  %s2158_s6 = smov 8  }
 0x2ef   :  { %1514 = dma.vmem_to_hbm [thread:$0]  %s1509_s23, 2048, %s2478_s3, [#allocation4], %s2157_s5, %s2157_s5, %s2158_s6  }
 0x2f0   :  { %2147 = dma.done.wait [#allocation4], 2048  }
 0x2f1   :  { %2148 = vsyncadd [#allocation4], 4294965248 }
 0x2f2   :  { %1518 = vsyncpa [#allocation3], 1 }
 0x2f3   :  { %1519 = vsyncpa [#allocation6], 1 }
 0x2f4   :  { %1520 = vsyncpa [#allocation4], 1 }

</bundles_post_ra>
